<compile_context>
chip_gen: v7x
topology: tpu7x:2x2x1
jax: 0.10.0
libtpu: 0.0.40
codegen_flags: <defaults>
</compile_context>

<pallas_src>
import functools

import numpy as np

import jax
import jax.numpy as jnp
from jax import lax
from jax.experimental import pallas as pl
from jax.experimental.pallas import tpu as pltpu

_MIN_RANGE = 1e-6
# Streaming roofline saturates around 512-row tiles; smaller tiles halve
# VMEM/vreg pressure at essentially no bandwidth loss.
_MAX_TILE_ROWS = 512


def _round_up(v, m):
    return ((v + m - 1) // m) * m


def _sublane_multiple(itemsize):
    # Native sublane tiling: (8,128) f32, (16,128) bf16, (32,128) int8/fp8.
    return max(8, 32 // max(int(itemsize), 1))


def _vmem_budgets():
    """Generation-aware VMEM budgets (v5e/v6e: 128 MiB, v7x: 64 MiB per TC)."""
    cap = 64 * 1024 * 1024                       # conservative default = v7x
    try:
        cap = int(pltpu.get_tpu_info().vmem_capacity_bytes)
    except Exception:                            # interpret mode / older jax
        pass
    tile_budget = max(4 << 20, cap // 4)         # ~25% of VMEM for live tiles
    vmem_limit = max(16 << 20, int(cap * 0.6))   # ~60% scoped-VMEM ceiling
    return tile_budget, vmem_limit


def _choose_tile_rows(m, h, in_bytes, out_bytes, tile_budget):
    """Largest row tile, aligned to the dtype sublane multiple, inside budget."""
    align = _sublane_multiple(in_bytes)
    if out_bytes:
        align = max(align, _sublane_multiple(out_bytes))
    # 2x: double-buffered in/out tiles; +8*h: ~two f32 temporaries per element
    # (promoted products / rounded values) so bf16/int8 inputs don't blow VMEM.
    per_row = 2 * h * (in_bytes + out_bytes) + 8 * h
    tm = tile_budget // max(per_row, 1)
    tm = min(tm, _MAX_TILE_ROWS, _round_up(m, align))
    tm = max(align, (tm // align) * align)
    return tm


# ----------------------------------------------------------------------------
# Kernels
# ----------------------------------------------------------------------------
def _per_token_kernel(x_ref, q_ref, s_ref, *, qp):
    # x_ref: (TM, H) tile of tokens; reduction over the last (lane) axis.
    # Rows past M in the final partial block are discarded on writeback, so
    # per-row statistics need no masking.
    x = x_ref[...]
    # abs/max run in the input dtype (bf16-native VPU on v6e/v7x); only the
    # (TM, 1) row statistic is promoted to f32 -> no whole-tile f32 copy.
    max_x = jnp.max(jnp.abs(x), axis=-1, keepdims=True).astype(jnp.float32)
    max_x = jnp.maximum(max_x, _MIN_RANGE)               # clamp_(1e-6)
    scale = max_x / qp                                    # per-row only
    inv = qp / max_x                                      # exact per-row inverse
    # q = round(x * (Qp/max)); the elementwise multiply promotes per-vreg.
    q = jnp.round(x * inv)
    q_ref[...] = q.astype(q_ref.dtype)
    # TODO(synk): lane-dense (1, TM) scale store (XLU transpose) would avoid
    # masked vst on the (TM, 1) column; kept column layout for lowering safety.
    s_ref[...] = scale.astype(s_ref.dtype)


def _block_absmax_kernel(x_ref, out_ref, *, valid_rows, block_rows, has_partial):
    # Per-block abs-max for the per_tensor path.  Reduction runs in the input
    # dtype; only the (1, 1) block statistic is promoted to f32.
    ax = jnp.abs(x_ref[...])

    def _reduce_store(vals):
        m = jnp.max(jnp.max(vals, axis=-1, keepdims=True), axis=0, keepdims=True)
        m = m.astype(jnp.float32)                          # (1, 1)
        out_ref[...] = jnp.broadcast_to(m[None], out_ref.shape)

    if not has_partial:
        # M % TM == 0 (statically known): no masking anywhere.
        _reduce_store(ax)
    else:
        i = pl.program_id(0)
        last = pl.num_programs(0) - 1

        @pl.when(i != last)
        def _():
            _reduce_store(ax)

        @pl.when(i == last)
        def _():
            # Mask garbage rows of the final partial block (abs >= 0, so 0 is
            # a safe identity; an all-zero input clamps to 1e-6 downstream,
            # exactly like the reference).
            rows = lax.broadcasted_iota(jnp.int32, ax.shape, 0)
            valid = (i * block_rows + rows) < valid_rows
            _reduce_store(jnp.where(valid, ax, jnp.zeros_like(ax)))


def _apply_scale_kernel(inv_ref, x_ref, q_ref):
    # inv_ref: (1,) f32 held in SMEM (global inverse scale for per_tensor).
    inv = inv_ref[0]
    q_ref[...] = jnp.round(x_ref[...] * inv).astype(q_ref.dtype)


# ----------------------------------------------------------------------------
# QuantAct wrapper (mirrors the nn.Module forward)
# ----------------------------------------------------------------------------
class QuantAct:
    """Symmetric signed activation quantizer (Pallas TPU implementation).

    q_type='per_token' reduces |x| over the last (hidden) axis per token;
    'per_tensor' reduces over the whole array via two tiled passes (abs-max,
    then quantize) -> inherently 2 reads + 1 write, ~1.67x the HBM traffic of
    per_token.  Prefer per_token where semantics allow, or fuse the abs-max
    pass into the producer of the activation.

    out_dtype: dtype of the quantized tensor q.  Default None keeps the input
    dtype (torch parity).  For production pass jnp.int8: the quantized values
    are integral with |q| <= Qp <= 127, so int8 is exact and cuts HBM
    writeback bytes 4x on this bandwidth-bound kernel (all generations).
    """

    def __init__(self, N_bits, q_type="per_token", signed=True, symmetric=True,
                 out_dtype=None):
        assert symmetric, "only symmetric quantization implemented"
        # TODO(synk): 'per_channel' (amax over dim 0) not wired up here.
        # TODO(synk): asymmetric (min/max + zero_point) path not implemented.
        assert q_type in ("per_token", "per_tensor")
        self.N_bits = N_bits
        self.q_type = q_type
        self.out_dtype = None if out_dtype is None else np.dtype(out_dtype)
        if N_bits is None:
            return
        if signed:
            self.Qp = 2 ** (N_bits - 1) - 1
        else:
            self.Qp = 2 ** N_bits - 1

    def __call__(self, x):
        if self.N_bits is None:
            return x, jnp.float32(1.0)
        if self.q_type == "per_token":
            return self._per_token(x)
        return self._per_tensor(x)

    # -- per_token: ceil-div grid over token tiles, reduce along hidden axis --
    def _per_token(self, x):
        orig_shape = x.shape
        H = orig_shape[-1]
        x2d = x.reshape(-1, H)                            # [M, H]
        M = x2d.shape[0]
        out_dtype = self.out_dtype or np.dtype(x.dtype)
        in_bytes = np.dtype(x.dtype).itemsize
        out_bytes = out_dtype.itemsize
        tile_budget, vmem_limit = _vmem_budgets()

        # VMEM-budgeted row tile, aligned to the dtype sublane multiple;
        # ceil-div grid handles non-divisible M (padded rows of the final
        # block are discarded on writeback).
        TM = _choose_tile_rows(M, H, in_bytes, out_bytes, tile_budget)
        grid = (pl.cdiv(M, TM),)

        # TODO(synk): on v7x verify in xprof that the parallel axis is split
        # across both TensorCores; on v5e consider pipeline_mode=pl.Buffered(3)
        # if DMA gaps show up between grid steps.
        kernel = functools.partial(_per_token_kernel, qp=float(self.Qp))
        q2d, s2d = pl.pallas_call(
            kernel,
            out_shape=(
                jax.ShapeDtypeStruct((M, H), out_dtype),
                jax.ShapeDtypeStruct((M, 1), jnp.float32),
            ),
            grid_spec=pltpu.PrefetchScalarGridSpec(
                num_scalar_prefetch=0,
                grid=grid,
                in_specs=[pl.BlockSpec((TM, H), lambda i: (i, 0))],
                out_specs=[
                    pl.BlockSpec((TM, H), lambda i: (i, 0)),
                    pl.BlockSpec((TM, 1), lambda i: (i, 0)),
                ],
            ),
            compiler_params=pltpu.CompilerParams(
                dimension_semantics=("parallel",),
                vmem_limit_bytes=vmem_limit),
            cost_estimate=pl.CostEstimate(
                flops=3 * M * H,
                transcendentals=0,
                bytes_accessed=M * H * (in_bytes + out_bytes) + M * 4),
        )(x2d)

        q = q2d.reshape(orig_shape)
        s = s2d.reshape(orig_shape[:-1] + (1,))           # keepdim=True
        return q, s

    # -- per_tensor: two tiled passes (abs-max reduce, then quantize) --------
    def _per_tensor(self, x):
        orig_shape = x.shape
        H = orig_shape[-1]
        x2d = x.reshape(-1, H)
        M = x2d.shape[0]
        out_dtype = self.out_dtype or np.dtype(x.dtype)
        in_bytes = np.dtype(x.dtype).itemsize
        out_bytes = out_dtype.itemsize
        qp = float(self.Qp)
        tile_budget, vmem_limit = _vmem_budgets()

        # Pass 1: per-block abs-max (parallel, pipelined), reduced in XLA.
        # TODO(synk): fuse this read-only reduction into the producer of x to
        # save one full HBM read of the activation.
        TM1 = _choose_tile_rows(M, H, in_bytes, 0, tile_budget)
        G1 = pl.cdiv(M, TM1)
        partial = pl.pallas_call(
            functools.partial(_block_absmax_kernel, valid_rows=M,
                              block_rows=TM1, has_partial=(M % TM1) != 0),
            out_shape=jax.ShapeDtypeStruct((G1, 1, 128), jnp.float32),
            grid_spec=pltpu.PrefetchScalarGridSpec(
                num_scalar_prefetch=0,
                grid=(G1,),
                in_specs=[pl.BlockSpec((TM1, H), lambda i: (i, 0))],
                out_specs=pl.BlockSpec((1, 1, 128), lambda i: (i, 0, 0)),
            ),
            compiler_params=pltpu.CompilerParams(
                dimension_semantics=("parallel",),
                vmem_limit_bytes=vmem_limit),
            cost_estimate=pl.CostEstimate(
                flops=2 * M * H,
                transcendentals=0,
                bytes_accessed=M * H * in_bytes + G1 * 128 * 4),
        )(x2d)

        max_x = jnp.maximum(jnp.max(partial), _MIN_RANGE)
        scale = max_x / qp                                 # 0-d, like torch
        inv = (qp / max_x).astype(jnp.float32).reshape(1)  # exact inverse scale

        # Pass 2: tiled multiply + round; global inverse scale lives in SMEM.
        TM2 = _choose_tile_rows(M, H, in_bytes, out_bytes, tile_budget)
        G2 = pl.cdiv(M, TM2)
        q2d = pl.pallas_call(
            _apply_scale_kernel,
            out_shape=jax.ShapeDtypeStruct((M, H), out_dtype),
            grid_spec=pltpu.PrefetchScalarGridSpec(
                num_scalar_prefetch=0,
                grid=(G2,),
                in_specs=[
                    pl.BlockSpec(memory_space=pltpu.MemorySpace.SMEM),
                    pl.BlockSpec((TM2, H), lambda i: (i, 0)),
                ],
                out_specs=pl.BlockSpec((TM2, H), lambda i: (i, 0)),
            ),
            compiler_params=pltpu.CompilerParams(
                dimension_semantics=("parallel",),
                vmem_limit_bytes=vmem_limit),
            cost_estimate=pl.CostEstimate(
                flops=2 * M * H,
                transcendentals=0,
                bytes_accessed=M * H * (in_bytes + out_bytes) + 4),
        )(inv, x2d)

        return q2d.reshape(orig_shape), scale


# ----------------------------------------------------------------------------
# Pure-JAX reference (mirrors the PyTorch forward) for verification
# ----------------------------------------------------------------------------
def _ref_quant(x, n_bits, q_type):
    qp = 2 ** (n_bits - 1) - 1
    if q_type == "per_token":
        max_x = jnp.max(jnp.abs(x), axis=-1, keepdims=True)
    else:
        max_x = jnp.max(jnp.abs(x))
    max_x = jnp.maximum(max_x, _MIN_RANGE)
    scale = max_x / qp
    return jnp.round(x / scale), scale


def _check(q, s, x, s_ref):
    # The kernel computes q = round(x * (Qp/max)) instead of round(x/(max/Qp));
    # the two agree except on (measure-zero) exact .5 boundaries, so validate
    # the rounding semantics directly instead of demanding bit-parity.
    assert jnp.allclose(s, s_ref, rtol=1e-6), "scale mismatch"
    qf = q.astype(jnp.float32)
    assert jnp.all(qf == jnp.round(qf)), "q not integral"
    assert jnp.max(jnp.abs(qf - x / s_ref)) <= 0.5 + 1e-3, \
        "q is not a correct rounding of x/scale"


if __name__ == "__main__":
    key = jax.random.PRNGKey(0)
    # small ViT-like activation: batch=2, seq=8, hidden=32
    x = jax.random.normal(key, (2, 8, 32), dtype=jnp.float32) * 3.0

    # --- per_token (typical activation quant path in the model) ---
    qact_tok = QuantAct(N_bits=8, q_type="per_token")
    q_tok, s_tok = qact_tok(x)
    q_tok, s_tok = jax.block_until_ready((q_tok, s_tok))
    _, s_ref = _ref_quant(x, 8, "per_token")
    assert q_tok.shape == (2, 8, 32) and s_tok.shape == (2, 8, 1)
    assert q_tok.dtype == x.dtype
    _check(q_tok, s_tok, x, s_ref)

    # --- per_tensor ---
    qact_ten = QuantAct(N_bits=8, q_type="per_tensor")
    q_ten, s_ten = qact_ten(x)
    q_ten, s_ten = jax.block_until_ready((q_ten, s_ten))
    _, s_ref2 = _ref_quant(x, 8, "per_tensor")
    assert q_ten.shape == (2, 8, 32) and s_ten.shape == ()
    _check(q_ten, s_ten, x, s_ref2)

    # --- per_token with narrow int8 writeback (production path: 4x fewer
    #     output bytes on this bandwidth-bound kernel) ---
    x2 = jax.random.normal(jax.random.PRNGKey(0), (4, 16, 128),
                           dtype=jnp.float32) * 2.0
    qact_i8 = QuantAct(N_bits=8, q_type="per_token", out_dtype=jnp.int8)
    q_i8, s_i8 = qact_i8(x2)
    q_i8, s_i8 = jax.block_until_ready((q_i8, s_i8))
    _, s_ref3 = _ref_quant(x2, 8, "per_token")
    assert q_i8.shape == (4, 16, 128) and q_i8.dtype == qact_i8.out_dtype
    assert s_i8.shape == (4, 16, 1)
    _check(q_i8, s_i8, x2, s_ref3)

    print("KERNEL_OK")
</pallas_src>

<mosaic_0001>
module attributes {stable_mosaic.version = 11 : i64} {
  func.func @_per_token_kernel(%arg0: i32, %arg1: memref<16x32xf32, #tpu.memory_space<vmem>>, %arg2: memref<16x32xf32, #tpu.memory_space<vmem>>, %arg3: memref<16x1xf32, #tpu.memory_space<vmem>>) attributes {dimension_semantics = [#tpu.dimension_semantics<parallel>], iteration_bounds = array<i64: 1>, scalar_prefetch = 0 : i64, scratch_operands = 0 : i64, tpu.core_type = #tpu.core_type<tc>, window_params = [{transform_indices = @transform_0, window_bounds = array<i64: 16, 32>}, {transform_indices = @transform_1, window_bounds = array<i64: 16, 32>}, {transform_indices = @transform_2, window_bounds = array<i64: 16, 1>}]} {
    %c0 = arith.constant 0 : index
    %c0_0 = arith.constant 0 : index
    %0 = vector.load %arg1[%c0, %c0_0] : memref<16x32xf32, #tpu.memory_space<vmem>>, vector<16x32xf32>
    %1 = math.absf %0 : vector<16x32xf32>
    %cst = arith.constant dense<0xFF800000> : vector<16xf32>
    %2 = vector.multi_reduction <maximumf>, %1, %cst [1] : vector<16x32xf32> to vector<16xf32>
    %3 = vector.shape_cast %2 : vector<16xf32> to vector<16x1xf32>
    %cst_1 = arith.constant 9.99999997E-7 : f32
    %4 = vector.broadcast %cst_1 : f32 to vector<16x1xf32>
    %5 = arith.maximumf %3, %4 : vector<16x1xf32>
    %cst_2 = arith.constant 1.270000e+02 : f32
    %6 = vector.broadcast %cst_2 : f32 to vector<16x1xf32>
    %7 = arith.divf %5, %6 : vector<16x1xf32>
    %cst_3 = arith.constant 1.270000e+02 : f32
    %8 = vector.broadcast %cst_3 : f32 to vector<16x1xf32>
    %9 = arith.divf %8, %5 : vector<16x1xf32>
    %10 = vector.broadcast %9 : vector<16x1xf32> to vector<16x32xf32>
    %11 = arith.mulf %0, %10 : vector<16x32xf32>
    %12 = math.roundeven %11 : vector<16x32xf32>
    %c0_4 = arith.constant 0 : index
    %c0_5 = arith.constant 0 : index
    %13 = vector.load %arg2[%c0_4, %c0_5] : memref<16x32xf32, #tpu.memory_space<vmem>>, vector<16x32xf32>
    tpu.vector_store %arg2[%c0_4, %c0_5], %12 {strides = array<i32>} : memref<16x32xf32, #tpu.memory_space<vmem>>, vector<16x32xf32>,
    %c0_6 = arith.constant 0 : index
    %c0_7 = arith.constant 0 : index
    %14 = vector.load %arg3[%c0_6, %c0_7] : memref<16x1xf32, #tpu.memory_space<vmem>>, vector<16x1xf32>
    tpu.vector_store %arg3[%c0_6, %c0_7], %7 {strides = array<i32>} : memref<16x1xf32, #tpu.memory_space<vmem>>, vector<16x1xf32>,
    return
  }
  func.func @transform_0(%arg0: i32) -> (i32, i32) {
    %c0_i32 = arith.constant 0 : i32
    %c0_i32_0 = arith.constant 0 : i32
    return %arg0, %c0_i32 : i32, i32
  }
  func.func @transform_1(%arg0: i32) -> (i32, i32) {
    %c0_i32 = arith.constant 0 : i32
    %c0_i32_0 = arith.constant 0 : i32
    return %arg0, %c0_i32 : i32, i32
  }
  func.func @transform_2(%arg0: i32) -> (i32, i32) {
    %c0_i32 = arith.constant 0 : i32
    %c0_i32_0 = arith.constant 0 : i32
    return %arg0, %c0_i32 : i32, i32
  }
}

</mosaic_0001>

<bundles_post_ra>
// kernel: tpu_custom_call.1
= control target key start
LH: loop header
LB: loop body
LE: loop exit
PB: predicated region body
PF: predicated region fallthrough
CT: control target
= control target key end

     0   :  { %8 = vsyncpa [#allocation3], 0  ;;  %s192_s0 = inlined_call_operand.hbm [shape: f32[16,32], index: 0, kind: input, shape index: {}]   ;;  %s193_s1 = inlined_call_operand.hbm [shape: f32[16,32], index: 1, kind: output, shape index: {0}]   ;;  %s194_s2 = inlined_call_operand.vmem [shape: f32[16,1], index: 2, kind: output, shape index: {1}]  }
   0x1   :  { %9 = vsyncpa [#allocation4], 0  ;;  %s133_s9 = smov [#allocation2]   ;;  %s85_s13 = scalar_lea.hbm %s192_s0, 256 }
   0x2   :  { %s15_s10 = sshll.u32 %s133_s9, 4  ;;  %p86_p0 = scmp.ne.s32.totalorder %s192_s0, %s85_s13  ;;  %s16_s10 = int_to_ptr.vmem [resolvable:$true] %s15_s10 }
   0x3   :  { %p89_p1 = scmp.lt.u32.totalorder %s85_s13, %s192_s0 }
   0x5   :  { %p91_p2 = pnand %p89_p1, %p86_p0 }
   0x7   :  { %94 = shalt.err (!%p91_p2)
}
   0x8   :  { %s95_s18 = scalar_lea.vmem %s16_s10, 256  ;;  %p100_p4 = scmp.lt.s32.totalorder %s16_s10, %s16_s10 }
   0x9   :  { %p96_p3 = scmp.ne.s32.totalorder %s16_s10, %s95_s18  ;;  %p101_p5 = scmp.lt.s32.totalorder %s95_s18, %s95_s18 }
   0xb   :  { %p102_p6 = por %p101_p5, %p100_p4 }
   0xd   :  { %p103_p7 = pnand %p102_p6, %p96_p3 }
   0xf   :  { %106 = shalt.err (!%p103_p7)
}
  0x10   :  { %s134_s19 = smov 128   ;;  %s135_s20 = smov 8  }
  0x11   :  { %21 = dma.hbm_to_vmem [thread:$0]  %s192_s0, 256, %s16_s10, [#allocation3], %s134_s19, %s134_s19, %s135_s20  }
  0x12   :  { %129 = dma.done.wait [#allocation3], 256  }
  0x13   :  { %130 = vsyncadd [#allocation3], 4294967040  ;;  %v25_v0 = vld [vmem:[#allocation2] sm:$0xff]  ;;  %vm29_vm0 = vcmask 261120   ;;  %v26_v1 = vld [vmem:[#allocation2 + $0x8] sm:$0xff]  ;;  %vm51_vm1 = vcmask 7168  }
  0x14   :  { %v27_v2 = vand.u32 2147483647, %v25_v0  ;;  %v28_v3 = vand.u32 2147483647, %v26_v1  ;;  %s136_s26 = smov [#allocation5]  }
  0x15   :  { %s59_s27 = sshll.u32 %s136_s26, 4  ;;  %s60_s27 = int_to_ptr.vmem [resolvable:$true] %s59_s27 }
  0x16   :  { %v30_v4 = vsel %vm29_vm0, %v27_v2, -inf  ;;  %v33_v5 = vsel %vm29_vm0, %v28_v3, -inf  ;;  %s107_s28 = scalar_lea.vmem %s60_s27, 256  ;;  %p112_p9 = scmp.lt.s32.totalorder %s60_s27, %s60_s27 }
  0x17   :  { %31 = vmax.xlane.f32.xlu0 %v30_v4  ;;  %p108_p8 = scmp.ne.s32.totalorder %s60_s27, %s107_s28  ;;  %p113_p10 = scmp.lt.s32.totalorder %s107_s28, %s107_s28 }
  0x19   :  { %p114_p11 = por %p113_p10, %p112_p9 }
  0x1b   :  { %34 = vmax.xlane.f32.xlu0 %v33_v5  ;;  %p115_p12 = pnand %p114_p11, %p108_p8 }
  0xa4   :  { %v32_v6 = vpop.xlane.xlu0 %31 }
  0xa5   :  { %v36_v7 = vmax.f32 %v32_v6, 1e-06 }
  0xa7   :  { %v39_v8 = vmul.f32 0.007874016, %v36_v7  ;;  %81 = vrcp.f32 %v36_v7 }
  0xa8   :  { %v35_v9 = vpop.xlane.xlu0 %34 }
  0xa9   :  { %52 = vst.msk [vmem:[%s194_s2] sm:$0xff] %vm51_vm1, %v39_v8  ;;  %v37_v10 = vmax.f32 %v35_v9, 1e-06 }
  0xab   :  { %v40_v11 = vmul.f32 0.007874016, %v37_v10  ;;  %83 = vrcp.f32 %v37_v10 }
  0xad   :  { %53 = vst.msk [vmem:[%s194_s2 + $0x8] sm:$0xff] %vm51_vm1, %v40_v11 }
  0xb1   :  { %v82_v12 = vpop.eup %81 }
  0xb2   :  { %v42_v13 = vmul.f32 127.0, %v82_v12 }
  0xb4   :  { %v45_v14 = vmul.f32 %v42_v13, %v25_v0 }
  0xb5   :  { %v84_v15 = vpop.eup %83 }
  0xb6   :  { %v75_v16 = vround.rtne.f32 %v45_v14  ;;  %v44_v17 = vmul.f32 127.0, %v84_v15 }
  0xb8   :  { %49 = vst.msk [vmem:[#allocation5] sm:$0xff] %vm29_vm0, %v75_v16  ;;  %v46_v18 = vmul.f32 %v44_v17, %v26_v1 }
  0xba   :  { %v76_v19 = vround.rtne.f32 %v46_v18 }
  0xbc   :  { %50 = vst.msk [vmem:[#allocation5 + $0x8] sm:$0xff] %vm29_vm0, %v76_v19 }
  0xbd   :  { %118 = shalt.err (!%p115_p12)
}
  0xbe   :  { %s119_s30 = scalar_lea.hbm %s193_s1, 256 }
  0xbf   :  { %p120_p13 = scmp.ne.s32.totalorder %s193_s1, %s119_s30  ;;  %p123_p0 = scmp.lt.u32.totalorder %s119_s30, %s193_s1 }
  0xc1   :  { %p125_p1 = pnand %p123_p0, %p120_p13 }
  0xc3   :  { %128 = shalt.err (!%p125_p1)
}
  0xc4   :  { %65 = dma.vmem_to_hbm [thread:$0]  %s60_s27, 256, %s193_s1, [#allocation4], %s134_s19, %s134_s19, %s135_s20  }
  0xc5   :  { %131 = dma.done.wait [#allocation4], 256  }
  0xc6   :  { %132 = vsyncadd [#allocation4], 4294967040 }
  0xc7   :  { %73 = vsyncpa [#allocation3], 1 }
  0xc8   :  { %74 = vsyncpa [#allocation4], 1 }

</bundles_post_ra>
